<compile_context>
chip_gen: v7x
topology: tpu7x:2x2x1
jax: 0.10.0
libtpu: 0.0.40
codegen_flags: <defaults>
</compile_context>

<pallas_src>
import functools
import math
from typing import NamedTuple, Optional

import jax
import jax.numpy as jnp
from jax.experimental import pallas as pl
from jax.experimental.pallas import tpu as pltpu


def _round_up(a: int, b: int) -> int:
    return (a + b - 1) // b * b


# ----------------------------------------------------------------------------
# Per-generation configuration
# ----------------------------------------------------------------------------
class _TpuConfig(NamedTuple):
    gen: Optional[str]
    vmem_limit: int
    default_tm: int
    two_tensorcores: bool


@functools.lru_cache(maxsize=None)
def _tpu_config() -> _TpuConfig:
    gen = None
    try:
        kind = jax.devices()[0].device_kind.lower()
    except Exception:  # pragma: no cover - defensive
        kind = ""
    if "v7" in kind:
        gen = "v7x"
    elif "v6" in kind:
        gen = "v6e"
    elif "v5p" in kind:
        gen = "v5p"
    elif "v5" in kind:
        gen = "v5e"
    elif "v4" in kind:
        gen = "v4"

    try:
        vmem_cap = int(pltpu.get_tpu_info().vmem_capacity_bytes)
    except Exception:  # pragma: no cover - defensive
        vmem_cap = (64 << 20) if gen == "v7x" else (128 << 20)

    # Explicit scoped-VMEM request (defaults of 16/32 MiB are too small for the
    # intended tile sizes): ~100 MiB on 128 MiB parts, ~56 MiB on v7x (64 MiB).
    vmem_limit = min(100 << 20, vmem_cap * 7 // 8)

    # v6e needs more row reuse (~670 flops/byte weight-stream roofline) than
    # v5e (~240) or v7x (~310), so it gets a bigger default row tile.
    default_tm = {"v6e": 1024, "v5e": 512, "v7x": 512}.get(gen, 512)
    two_tc = gen in ("v7x", "v4", "v5p")
    return _TpuConfig(gen=gen, vmem_limit=vmem_limit, default_tm=default_tm,
                      two_tensorcores=two_tc)


def _largest_dividing_tile(hp: int, th_req: int) -> int:
    """Largest multiple of 128 that is <= th_req and divides hp (hp % 128 == 0)."""
    th_req = max(128, min(th_req // 128 * 128, hp))
    for cand in range(th_req, 127, -128):
        if hp % cand == 0:
            return cand
    return 128


def _auto_th(dim: int, hp: int, wbytes: int, cfg: _TpuConfig) -> int:
    # Budget ~half of scoped VMEM for the double-buffered weight blocks
    # (w12: dim*2*th, wp: th*dim), leaving the rest for x / out / acc tiles.
    budget = cfg.vmem_limit // 2
    th = 512
    while th > 128 and 2 * 3 * dim * th * wbytes > budget:
        th //= 2
    return _largest_dividing_tile(hp, th)


def _pick_tm(M: int, dim: int, th: int, wbytes: int, xbytes: int, obytes: int,
             use_acc: bool, cfg: _TpuConfig, tm_req: Optional[int]) -> int:
    tm = cfg.default_tm if tm_req is None else tm_req
    # On 2-TensorCore parts make sure the parallel row axis has >= 2 tiles so
    # megacore can split it across cores.
    if cfg.two_tensorcores and M > 8:
        tm = min(tm, _round_up(-(-M // 2), 8))
    tm = max(8, min(_round_up(tm, 8), _round_up(M, 8)))

    weight_ws = 2 * (dim * 2 * th + th * dim) * wbytes  # double-buffered weights

    def working_set(t):
        s = weight_ws + 2 * t * dim * xbytes + 2 * t * dim * obytes
        if use_acc:
            s += t * dim * 4
        return s

    while tm > 8 and working_set(tm) > cfg.vmem_limit:
        tm = max(8, _round_up(tm // 2, 8))
    return tm


# ----------------------------------------------------------------------------
# Parameter preparation (weight fusion done ONCE, off the hot path)
# ----------------------------------------------------------------------------
class T6MLPParams(NamedTuple):
    w12: jax.Array   # (dim, nh*2*th): per-chunk fused [w1 | w2], hidden padded
    wp: jax.Array    # (Hp, dim): projection weight, hidden padded
    dim: int
    hidden: int
    th: int


def prepare_t6mlp_params(w1_t, w2_t, wp_t, *, th: Optional[int] = None,
                         compute_dtype=None) -> T6MLPParams:
    """Pad + fuse weights once.  w1_t/w2_t: (dim, hidden); wp_t: (hidden, dim).

    These are the (in, out) transposes of the PyTorch (out, in) Linear weights.
    compute_dtype: cast weights (e.g. jnp.bfloat16) for native MXU rate and
    half the weight DMA; recommended on v5e.  Accumulation is always f32.
    """
    dim, hidden = w1_t.shape
    assert w2_t.shape == (dim, hidden)
    assert wp_t.shape == (hidden, dim)

    if compute_dtype is not None:
        w1_t = w1_t.astype(compute_dtype)
        w2_t = w2_t.astype(compute_dtype)
        wp_t = wp_t.astype(compute_dtype)

    cfg = _tpu_config()
    wbytes = jnp.dtype(w1_t.dtype).itemsize

    # Pad hidden to a multiple of 128 first, then pick th dividing the padded
    # size (no extra th-rounding waste streamed through the MXU).
    hp = _round_up(hidden, 128)
    if th is None:
        th = _auto_th(dim, hp, wbytes, cfg)
    else:
        th = _largest_dividing_tile(hp, th)

    pad = hp - hidden
    if pad:
        w1_t = jnp.pad(w1_t, ((0, 0), (0, pad)))
        w2_t = jnp.pad(w2_t, ((0, 0), (0, pad)))
        wp_t = jnp.pad(wp_t, ((0, pad), (0, 0)))

    nh = hp // th
    # Columns [c*2*th, c*2*th+th) hold the w1 chunk, [c*2*th+th, (c+1)*2*th) the
    # w2 chunk, so each grid step streams ONE contiguous (dim, 2*th) block.
    w12 = jnp.concatenate(
        [w1_t.reshape(dim, nh, th), w2_t.reshape(dim, nh, th)], axis=2
    ).reshape(dim, nh * 2 * th)

    return T6MLPParams(w12=w12, wp=wp_t, dim=dim, hidden=hidden, th=th)


# ----------------------------------------------------------------------------
# Kernels
# ----------------------------------------------------------------------------
def _silu_gate(x12, th, approx_rcp):
    x1 = x12[:, :th]
    x2 = x12[:, th:]
    # exp + reciprocal both go to the EUP slot (slack in this MXU-bound kernel).
    # Approx reciprocal only on the bf16 path, where its error is negligible.
    return x1 * x2 * pl.reciprocal(1.0 + jnp.exp(-x1), approx=approx_rcp)


def _t6mlp_kernel_accout(x_ref, w12_ref, wp_ref, o_ref, *, approx_rcp):
    # Output dtype is f32: the resident output block is the accumulator.
    h = pl.program_id(1)

    @pl.when(h == 0)
    def _():
        o_ref[...] = jnp.zeros_like(o_ref)

    th = w12_ref.shape[1] // 2
    x12 = jnp.dot(x_ref[...], w12_ref[...], preferred_element_type=jnp.float32)
    g = _silu_gate(x12, th, approx_rcp)
    o_ref[...] += jnp.dot(g.astype(wp_ref.dtype), wp_ref[...],
                          preferred_element_type=jnp.float32)


def _t6mlp_kernel_scratch(x_ref, w12_ref, wp_ref, o_ref, acc_ref, *, approx_rcp):
    # Non-f32 output: accumulate in a f32 VMEM scratch, downcast at the end.
    h = pl.program_id(1)

    @pl.when(h == 0)
    def _():
        acc_ref[...] = jnp.zeros_like(acc_ref)

    th = w12_ref.shape[1] // 2
    x12 = jnp.dot(x_ref[...], w12_ref[...], preferred_element_type=jnp.float32)
    g = _silu_gate(x12, th, approx_rcp)
    acc_ref[...] += jnp.dot(g.astype(wp_ref.dtype), wp_ref[...],
                            preferred_element_type=jnp.float32)

    @pl.when(h == pl.num_programs(1) - 1)
    def _():
        o_ref[...] = acc_ref[...].astype(o_ref.dtype)


# ----------------------------------------------------------------------------
# Forward
# ----------------------------------------------------------------------------
def t6mlp_forward(x, params: T6MLPParams, *, tm: Optional[int] = None):
    """x: (..., dim).  Returns (..., dim) in x's dtype (f32 accumulation)."""
    dim = params.dim
    assert x.shape[-1] == dim
    lead = x.shape[:-1]

    out_dtype = x.dtype
    cdt = params.w12.dtype
    if x.dtype != cdt:
        x = x.astype(cdt)

    x2d = x.reshape(-1, dim)
    M = x2d.shape[0]

    cfg = _tpu_config()
    wbytes = jnp.dtype(cdt).itemsize
    obytes = jnp.dtype(out_dtype).itemsize
    use_acc = jnp.dtype(out_dtype) != jnp.dtype(jnp.float32)

    th = params.th
    hp = params.wp.shape[0]
    nh = hp // th

    tm = _pick_tm(M, dim, th, wbytes, wbytes, obytes, use_acc, cfg, tm)
    Mp = _round_up(M, tm)
    if Mp != M:
        x2d = jnp.pad(x2d, ((0, Mp - M), (0, 0)))

    n_row_tiles = Mp // tm
    cost = pl.CostEstimate(
        flops=6 * Mp * dim * hp,          # 2*M*d*(2H) gate/up + 2*M*H*d projection
        transcendentals=Mp * hp,          # one exp per hidden activation
        bytes_accessed=int(
            Mp * dim * wbytes                                        # x streamed once
            + n_row_tiles * (params.w12.size + params.wp.size) * wbytes  # weights per row tile
            + Mp * dim * obytes),
    )

    approx_rcp = jnp.dtype(cdt) != jnp.dtype(jnp.float32)
    if use_acc:
        kernel = functools.partial(_t6mlp_kernel_scratch, approx_rcp=approx_rcp)
        scratch = [pltpu.VMEM((tm, dim), jnp.float32)]
    else:
        kernel = functools.partial(_t6mlp_kernel_accout, approx_rcp=approx_rcp)
        scratch = []

    out2d = pl.pallas_call(
        kernel,
        out_shape=jax.ShapeDtypeStruct((Mp, dim), out_dtype),
        grid_spec=pltpu.PrefetchScalarGridSpec(
            num_scalar_prefetch=0,
            grid=(n_row_tiles, nh),  # rows parallel, hidden (reduction) last
            in_specs=[
                pl.BlockSpec((tm, dim), lambda i, h: (i, 0)),
                pl.BlockSpec((dim, 2 * th), lambda i, h: (0, h)),
                pl.BlockSpec((th, dim), lambda i, h: (h, 0)),
            ],
            out_specs=pl.BlockSpec((tm, dim), lambda i, h: (i, 0)),
            scratch_shapes=scratch,
        ),
        compiler_params=pltpu.CompilerParams(
            dimension_semantics=("parallel", "arbitrary"),
            vmem_limit_bytes=cfg.vmem_limit),
        cost_estimate=cost,
    )(x2d, params.w12, params.wp)

    return out2d[:M].reshape(*lead, dim)


# ----------------------------------------------------------------------------
# Init / reference (for testing)
# ----------------------------------------------------------------------------
def init_t6mlp_params(key, dim, dtype=jnp.float32, zero_proj=True):
    """Synthetic init matching the module's shapes, returned in (in, out) layout.

    zero_proj=True matches c_proj.weight.data.zero_(); zero_proj=False gives a
    random projection so the second matmul is actually exercised by tests.
    """
    hidden = math.floor(8 / 3 * dim)
    k1, k2, k3 = jax.random.split(key, 3)
    bound = 1.0 / math.sqrt(dim)
    w_fc1 = jax.random.uniform(k1, (hidden, dim), dtype, -bound, bound)
    w_fc2 = jax.random.uniform(k2, (hidden, dim), dtype, -bound, bound)
    if zero_proj:
        w_proj = jnp.zeros((dim, hidden), dtype)
    else:
        bound_p = 1.0 / math.sqrt(hidden)
        w_proj = jax.random.uniform(k3, (dim, hidden), dtype, -bound_p, bound_p)
    return w_fc1.T, w_fc2.T, w_proj.T  # (in, out) layout


def t6mlp_ref(x, w1_t, w2_t, wp_t):
    x1 = x @ w1_t
    x2 = x @ w2_t
    return (jax.nn.silu(x1) * x2) @ wp_t


if __name__ == "__main__":
    key = jax.random.PRNGKey(0)
    kx1, kx2, kp1, kp2 = jax.random.split(key, 4)

    # Case 1: dim=48 -> hidden=128 (128-aligned), random projection, f32 path.
    dim1, B1, T1 = 48, 2, 8
    x1 = jax.random.normal(kx1, (B1, T1, dim1), jnp.float32)
    w1a, w2a, wpa = init_t6mlp_params(kp1, dim1, zero_proj=False)
    params_a = prepare_t6mlp_params(w1a, w2a, wpa)   # fused ONCE, reused below
    out1 = jax.block_until_ready(t6mlp_forward(x1, params_a))
    ref1 = t6mlp_ref(x1, w1a, w2a, wpa)
    assert out1.shape == (B1, T1, dim1)
    assert jnp.allclose(out1, ref1, atol=1e-5, rtol=1e-5)

    # Case 2: row padding (M=5) and hidden padding (hidden=64 -> 128).
    dim2, B2, T2 = 24, 1, 5
    x2 = jax.random.normal(kx2, (B2, T2, dim2), jnp.float32)
    w1b, w2b, wpb = init_t6mlp_params(kp2, dim2, zero_proj=False)
    params_b = prepare_t6mlp_params(w1b, w2b, wpb)
    out2 = jax.block_until_ready(t6mlp_forward(x2, params_b))
    ref2 = t6mlp_ref(x2, w1b, w2b, wpb)
    assert out2.shape == (B2, T2, dim2)
    assert jnp.allclose(out2, ref2, atol=1e-5, rtol=1e-5)

    # Case 3: module-default zero-initialized c_proj -> output must be exactly 0.
    w1c, w2c, wpc = init_t6mlp_params(kp1, dim1, zero_proj=True)
    out3 = jax.block_until_ready(
        t6mlp_forward(x1, prepare_t6mlp_params(w1c, w2c, wpc)))
    assert jnp.allclose(out3, jnp.zeros_like(out3))

    # Case 4: bf16 weights, f32 activations/output (accumulate-into-output path).
    params_bf16 = prepare_t6mlp_params(w1a, w2a, wpa, compute_dtype=jnp.bfloat16)
    out4 = jax.block_until_ready(t6mlp_forward(x1, params_bf16))
    assert jnp.allclose(out4, ref1, atol=1e-1, rtol=5e-2)

    # Case 5: bf16 everywhere (exercises the f32 VMEM-scratch accumulator path).
    out5 = jax.block_until_ready(
        t6mlp_forward(x1.astype(jnp.bfloat16), params_bf16))
    assert out5.dtype == jnp.bfloat16
    assert jnp.allclose(out5.astype(jnp.float32), ref1, atol=1e-1, rtol=5e-2)

    print("KERNEL_OK")
</pallas_src>

<mosaic_0001>
module attributes {stable_mosaic.version = 11 : i64} {
  func.func @_t6mlp_kernel_accout(%arg0: i32, %arg1: i32, %arg2: memref<16x48xf32, #tpu.memory_space<vmem>>, %arg3: memref<48x256xf32, #tpu.memory_space<vmem>>, %arg4: memref<128x48xf32, #tpu.memory_space<vmem>>, %arg5: memref<16x48xf32, #tpu.memory_space<vmem>>) attributes {dimension_semantics = [#tpu.dimension_semantics<parallel>, #tpu.dimension_semantics<arbitrary>], iteration_bounds = array<i64: 1, 1>, scalar_prefetch = 0 : i64, scratch_operands = 0 : i64, tpu.core_type = #tpu.core_type<tc>, window_params = [{transform_indices = @transform_0, window_bounds = array<i64: 16, 48>}, {transform_indices = @transform_1, window_bounds = array<i64: 48, 256>}, {transform_indices = @transform_2, window_bounds = array<i64: 128, 48>}, {transform_indices = @transform_3, window_bounds = array<i64: 16, 48>}]} {
    %c0_i32 = arith.constant 0 : i32
    %0 = arith.cmpi eq, %arg1, %c0_i32 : i32
    %1 = arith.extui %0 : i1 to i32
    %c0_i32_0 = arith.constant 0 : i32
    %2 = arith.cmpi ne, %1, %c0_i32_0 : i32
    scf.if %2 {
      %cst_13 = arith.constant 0.000000e+00 : f32
      %21 = vector.broadcast %cst_13 : f32 to vector<16x48xf32>
      %c0_14 = arith.constant 0 : index
      %c0_15 = arith.constant 0 : index
      %22 = vector.load %arg5[%c0_14, %c0_15] : memref<16x48xf32, #tpu.memory_space<vmem>>, vector<16x48xf32>
      tpu.vector_store %arg5[%c0_14, %c0_15], %21 {strides = array<i32>} : memref<16x48xf32, #tpu.memory_space<vmem>>, vector<16x48xf32>,
    } else {
    }
    %c0 = arith.constant 0 : index
    %c0_1 = arith.constant 0 : index
    %3 = vector.load %arg2[%c0, %c0_1] : memref<16x48xf32, #tpu.memory_space<vmem>>, vector<16x48xf32>
    %c0_2 = arith.constant 0 : index
    %c0_3 = arith.constant 0 : index
    %4 = vector.load %arg3[%c0_2, %c0_3] : memref<48x256xf32, #tpu.memory_space<vmem>>, vector<48x256xf32>
    %cst = arith.constant dense<0.000000e+00> : vector<16x256xf32>
    %5 = tpu.matmul %3, %4, %cst {dimension_numbers = #tpu.dot_dimension_numbers<[1], [0], [0], [1], [0, 0, 1, 1], [], []>} : vector<16x48xf32>, vector<48x256xf32>, vector<16x256xf32> -> vector<16x256xf32>
    %6 = vector.extract_strided_slice %5 {offsets = [0, 0], sizes = [16, 128], strides = [1, 1]} : vector<16x256xf32> to vector<16x128xf32>
    %7 = vector.extract_strided_slice %5 {offsets = [0, 128], sizes = [16, 128], strides = [1, 1]} : vector<16x256xf32> to vector<16x128xf32>
    %8 = arith.mulf %6, %7 : vector<16x128xf32>
    %cst_4 = arith.constant 0.000000e+00 : f32
    %9 = vector.broadcast %cst_4 : f32 to vector<16x128xf32>
    %10 = arith.subf %9, %6 : vector<16x128xf32>
    %11 = math.exp %10 : vector<16x128xf32>
    %cst_5 = arith.constant 1.000000e+00 : f32
    %12 = vector.broadcast %cst_5 : f32 to vector<16x128xf32>
    %13 = arith.addf %12, %11 : vector<16x128xf32>
    %14 = tpu.reciprocal %13 : vector<16x128xf32> -> vector<16x128xf32>
    %15 = arith.mulf %8, %14 : vector<16x128xf32>
    %c0_6 = arith.constant 0 : index
    %c0_7 = arith.constant 0 : index
    %16 = vector.load %arg5[%c0_6, %c0_7] : memref<16x48xf32, #tpu.memory_space<vmem>>, vector<16x48xf32>
    %c0_8 = arith.constant 0 : index
    %c0_9 = arith.constant 0 : index
    %17 = vector.load %arg4[%c0_8, %c0_9] : memref<128x48xf32, #tpu.memory_space<vmem>>, vector<128x48xf32>
    %cst_10 = arith.constant dense<0.000000e+00> : vector<16x48xf32>
    %18 = tpu.matmul %15, %17, %cst_10 {dimension_numbers = #tpu.dot_dimension_numbers<[1], [0], [0], [1], [0, 0, 1, 1], [], []>} : vector<16x128xf32>, vector<128x48xf32>, vector<16x48xf32> -> vector<16x48xf32>
    %19 = arith.addf %16, %18 : vector<16x48xf32>
    %c0_11 = arith.constant 0 : index
    %c0_12 = arith.constant 0 : index
    %20 = vector.load %arg5[%c0_11, %c0_12] : memref<16x48xf32, #tpu.memory_space<vmem>>, vector<16x48xf32>
    tpu.vector_store %arg5[%c0_11, %c0_12], %19 {strides = array<i32>} : memref<16x48xf32, #tpu.memory_space<vmem>>, vector<16x48xf32>,
    return
  }
  func.func @transform_0(%arg0: i32, %arg1: i32) -> (i32, i32) {
    %c0_i32 = arith.constant 0 : i32
    %c0_i32_0 = arith.constant 0 : i32
    return %arg0, %c0_i32 : i32, i32
  }
  func.func @transform_1(%arg0: i32, %arg1: i32) -> (i32, i32) {
    %c0_i32 = arith.constant 0 : i32
    %c0_i32_0 = arith.constant 0 : i32
    return %c0_i32, %arg1 : i32, i32
  }
  func.func @transform_2(%arg0: i32, %arg1: i32) -> (i32, i32) {
    %c0_i32 = arith.constant 0 : i32
    %c0_i32_0 = arith.constant 0 : i32
    return %arg1, %c0_i32 : i32, i32
  }
  func.func @transform_3(%arg0: i32, %arg1: i32) -> (i32, i32) {
    %c0_i32 = arith.constant 0 : i32
    %c0_i32_0 = arith.constant 0 : i32
    return %arg0, %c0_i32 : i32, i32
  }
}

</mosaic_0001>

<bundles_post_ra>
// kernel: tpu_custom_call.1
= control target key start
LH: loop header
LB: loop body
LE: loop exit
PB: predicated region body
PF: predicated region fallthrough
CT: control target
= control target key end

     0   :  { %8 = vsyncpa [#allocation3], 0  ;;  %s592_s0 = inlined_call_operand.hbm [shape: f32[16,48], index: 0, kind: input, shape index: {}]   ;;  %s593_s1 = inlined_call_operand.hbm [shape: f32[48,256], index: 1, kind: input, shape index: {}]   ;;  %s594_s2 = inlined_call_operand.hbm [shape: f32[128,48], index: 2, kind: input, shape index: {}]   ;;  %s595_s3 = inlined_call_operand.hbm [shape: f32[16,48], index: 3, kind: output, shape index: {}]  }
   0x1   :  { %9 = vsyncpa [#allocation6], 0 }
   0x2   :  { %10 = vsyncpa [#allocation4], 0  ;;  %s500_s12 = smov [#allocation5]   ;;  %s406_s16 = scalar_lea.hbm %s593_s1, 1536 }
   0x3   :  { %s28_s13 = sshll.u32 %s500_s12, 4  ;;  %p407_p0 = scmp.ne.s32.totalorder %s593_s1, %s406_s16  ;;  %s29_s13 = int_to_ptr.vmem [resolvable:$true] %s28_s13 }
   0x4   :  { %p410_p1 = scmp.lt.u32.totalorder %s406_s16, %s593_s1 }
   0x6   :  { %p412_p2 = pnand %p410_p1, %p407_p0 }
   0x8   :  { %415 = shalt.err (!%p412_p2)
}
   0x9   :  { %s416_s21 = scalar_lea.vmem %s29_s13, 1536  ;;  %p421_p4 = scmp.lt.s32.totalorder %s29_s13, %s29_s13 }
   0xa   :  { %p417_p3 = scmp.ne.s32.totalorder %s29_s13, %s416_s21  ;;  %p422_p5 = scmp.lt.s32.totalorder %s416_s21, %s416_s21 }
   0xc   :  { %p423_p6 = por %p422_p5, %p421_p4 }
   0xe   :  { %p424_p7 = pnand %p423_p6, %p417_p3 }
  0x10   :  { %427 = shalt.err (!%p424_p7)
}
  0x11   :  { %s501_s22 = smov 256   ;;  %s502_s23 = smov 16  }
  0x12   :  { %34 = dma.hbm_to_vmem [thread:$0]  %s593_s1, 1536, %s29_s13, [#allocation6], %s501_s22, %s501_s22, %s502_s23  }
  0x13   :  { %s503_s26 = smov [#allocation2]   ;;  %s428_s30 = scalar_lea.hbm %s592_s0, 256 }
  0x14   :  { %s16_s27 = sshll.u32 %s503_s26, 4  ;;  %p429_p8 = scmp.ne.s32.totalorder %s592_s0, %s428_s30  ;;  %s17_s27 = int_to_ptr.vmem [resolvable:$true] %s16_s27 }
  0x15   :  { %p432_p9 = scmp.lt.u32.totalorder %s428_s30, %s592_s0 }
  0x17   :  { %p434_p10 = pnand %p432_p9, %p429_p8 }
  0x19   :  { %437 = shalt.err (!%p434_p10)
}
  0x1a   :  { %s438_s8 = scalar_lea.vmem %s17_s27, 256  ;;  %p443_p12 = scmp.lt.s32.totalorder %s17_s27, %s17_s27 }
  0x1b   :  { %p439_p11 = scmp.ne.s32.totalorder %s17_s27, %s438_s8  ;;  %p444_p13 = scmp.lt.s32.totalorder %s438_s8, %s438_s8 }
  0x1d   :  { %p445_p0 = por %p444_p13, %p443_p12 }
  0x1f   :  { %p446_p1 = pnand %p445_p0, %p439_p11 }
  0x21   :  { %449 = shalt.err (!%p446_p1)
}
  0x22   :  { %s504_s1 = smov 128   ;;  %s505_s9 = smov 8  }
  0x23   :  { %22 = dma.hbm_to_vmem [thread:$0]  %s592_s0, 256, %s17_s27, [#allocation3], %s504_s1, %s504_s1, %s505_s9  }
  0x24   :  { %s506_s12 = smov [#allocation7]   ;;  %s450_s16 = scalar_lea.hbm %s594_s2, 2048 }
  0x25   :  { %s40_s13 = sshll.u32 %s506_s12, 4  ;;  %p451_p2 = scmp.ne.s32.totalorder %s594_s2, %s450_s16  ;;  %s41_s13 = int_to_ptr.vmem [resolvable:$true] %s40_s13 }
  0x26   :  { %p454_p3 = scmp.lt.u32.totalorder %s450_s16, %s594_s2 }
  0x28   :  { %p456_p4 = pnand %p454_p3, %p451_p2 }
  0x2a   :  { %459 = shalt.err (!%p456_p4)
}
  0x2b   :  { %s460_s21 = scalar_lea.vmem %s41_s13, 2048  ;;  %p465_p6 = scmp.lt.s32.totalorder %s41_s13, %s41_s13 }
  0x2c   :  { %p461_p5 = scmp.ne.s32.totalorder %s41_s13, %s460_s21  ;;  %p466_p7 = scmp.lt.s32.totalorder %s460_s21, %s460_s21 }
  0x2e   :  { %p467_p8 = por %p466_p7, %p465_p6 }
  0x30   :  { %p468_p9 = pnand %p467_p8, %p461_p5 }
  0x32   :  { %471 = shalt.err (!%p468_p9)
}
  0x33   :  { %46 = dma.hbm_to_vmem [thread:$0]  %s594_s2, 2048, %s41_s13, [#allocation6], %s504_s1, %s504_s1, %s505_s9  }
  0x34   :  { %494 = dma.done.wait [#allocation3], 256  }
  0x35   :  { %495 = vsyncadd [#allocation3], 4294967040 }
  0x36   :  { %496 = dma.done.wait [#allocation6], 3584  }
  0x37   :  { %497 = vsyncadd [#allocation6], 4294963712  ;;  %vm60_vm0 = vcmask 392192   ;;  %v507_v0 = vmov 0.0   ;;  %v66_v1 = vld [vmem:[#allocation5 + $0x8] sm:$0xff]  ;;  %v68_v2 = vld [vmem:[#allocation5 + $0x18] sm:$0xff] }
  0x38   :  { %61 = vst.msk [vmem:[#allocation8] sm:$0xff] %vm60_vm0, %v507_v0  ;;  %62 = vst.msk [vmem:[#allocation8 + $0x8] sm:$0xff] %vm60_vm0, %v507_v0  ;;  %148 = vmatprep.mubr.f32.mxu0 %v507_v0  ;;  %v65_v3 = vld [vmem:[#allocation5] sm:$0xff]  ;;  %v345_v4 = vpack.c.bf16 %v68_v2, %v66_v1  ;;  %v67_v5 = vld [vmem:[#allocation5 + $0x10] sm:$0xff]  ;;  %s508_s2 = smov [#allocation8]  }
  0x39   :  { %v70_v6 = vld [vmem:[#allocation5 + $0x28] sm:$0xff]  ;;  %v72_v7 = vld [vmem:[#allocation5 + $0x38] sm:$0xff]  ;;  %v347_v8 = vpack.c.bf16 %v67_v5, %v65_v3  ;;  %v69_v10 = vld [vmem:[#allocation5 + $0x20] sm:$0xff]  ;;  %s277_s23 = sshll.u32 %s508_s2, 4  ;;  %s278_s23 = int_to_ptr.vmem [resolvable:$true] %s277_s23 }
  0x3a   :  { %v349_v9 = vpack.c.bf16 %v72_v7, %v70_v6  ;;  %v71_v11 = vld [vmem:[#allocation5 + $0x30] sm:$0xff]  ;;  %v74_v12 = vld [vmem:[#allocation5 + $0x48] sm:$0xff]  ;;  %346 = vmatprep.subr.bf16.mxu0 %v345_v4  ;;  %v76_v13 = vld [vmem:[#allocation5 + $0x58] sm:$0xff]  ;;  %s472_s24 = scalar_lea.vmem %s278_s23, 256  ;;  %p477_p11 = scmp.lt.s32.totalorder %s278_s23, %s278_s23 }
  0x3b   :  { %348 = vmatpush1.bf16.msra.mxu0 %v347_v8  ;;  %v351_v14 = vpack.c.bf16 %v71_v11, %v69_v10  ;;  %v353_v15 = vpack.c.bf16 %v76_v13, %v74_v12  ;;  %v73_v16 = vld [vmem:[#allocation5 + $0x40] sm:$0xff]  ;;  %v75_v17 = vld [vmem:[#allocation5 + $0x50] sm:$0xff]  ;;  %v64_v20 = vld [vmem:[#allocation2 + $0x8] sm:$0xff]  ;;  %p473_p10 = scmp.ne.s32.totalorder %s278_s23, %s472_s24  ;;  %p478_p12 = scmp.lt.s32.totalorder %s472_s24, %s472_s24 }
  0x3c   :  { %350 = vmatprep.subr.bf16.mxu0 %v349_v9  ;;  %v355_v18 = vpack.c.bf16 %v75_v17, %v73_v16  ;;  %v63_v19 = vld [vmem:[#allocation2] sm:$0xff]  ;;  %v177_v21 = vld [vmem:[#allocation7] sm:$0xff]  ;;  %v178_v22 = vld [vmem:[#allocation7 + $0x8] sm:$0xff] }
  0x3d   :  { %v357_v23 = vpack.c.bf16 %v178_v22, %v177_v21  ;;  %v179_v24 = vld [vmem:[#allocation7 + $0x10] sm:$0xff]  ;;  %v180_v25 = vld [vmem:[#allocation7 + $0x18] sm:$0xff]  ;;  %v181_v27 = vld [vmem:[#allocation7 + $0x20] sm:$0xff]  ;;  %p479_p13 = por %p478_p12, %p477_p11 }
  0x3e   :  { %v361_v26 = vpack.c.bf16 %v180_v25, %v179_v24  ;;  %v182_v28 = vld [vmem:[#allocation7 + $0x28] sm:$0xff]  ;;  %v183_v30 = vld [vmem:[#allocation7 + $0x30] sm:$0xff]  ;;  %v184_v31 = vld [vmem:[#allocation7 + $0x38] sm:$0xff] }
  0x3f   :  { %352 = vmatpush1.bf16.msra.mxu0 %v351_v14  ;;  %358 = vmatprep.subr.bf16.mxu1 %v357_v23  ;;  %v365_v29 = vpack.c.bf16 %v182_v28, %v181_v27  ;;  %v369_v32 = vpack.c.bf16 %v184_v31, %v183_v30  ;;  %v185_v33 = vld [vmem:[#allocation7 + $0x40] sm:$0xff]  ;;  %v186_v34 = vld [vmem:[#allocation7 + $0x48] sm:$0xff]  ;;  %v187_v36 = vld [vmem:[#allocation7 + $0x50] sm:$0xff]  ;;  %p480_p0 = pnand %p479_p13, %p473_p10 }
  0x40   :  { %354 = vmatprep.subr.bf16.mxu0 %v353_v15  ;;  %360 = vmatpush3.bf16.msra.mxu1 %v357_v23  ;;  %v373_v35 = vpack.c.bf16 %v186_v34, %v185_v33  ;;  %v188_v37 = vld [vmem:[#allocation7 + $0x58] sm:$0xff]  ;;  %v189_v39 = vld [vmem:[#allocation7 + $0x60] sm:$0xff]  ;;  %v190_v40 = vld [vmem:[#allocation7 + $0x68] sm:$0xff] }
  0x41   :  { %362 = vmatprep.subr.bf16.mxu1 %v361_v26  ;;  %v377_v38 = vpack.c.bf16 %v188_v37, %v187_v36  ;;  %v381_v41 = vpack.c.bf16 %v190_v40, %v189_v39  ;;  %v191_v42 = vld [vmem:[#allocation7 + $0x70] sm:$0xff]  ;;  %v192_v43 = vld [vmem:[#allocation7 + $0x78] sm:$0xff]  ;;  %v176_v63 = vld [vmem:[#allocation8 + $0x8] sm:$0xff] }
  0x42   :  { %v385_v44 = vpack.c.bf16 %v192_v43, %v191_v42 }
  0x43   :  { %356 = vmatpush1.bf16.msra.mxu0 %v355_v18 }
  0x44   :  { %364 = vmatpush3.bf16.msra.mxu1 %v361_v26 }
  0x45   :  { %366 = vmatprep.subr.bf16.mxu1 %v365_v29 }
  0x46   :  { %290 = vmatmul.mubr.msk.f32.vlgmr.msra.gmra.mrb[0].mxu0 %vm60_vm0, %v63_v19 }
  0x47   :  { %154 = vmatprep.mubr.f32.mxu0 %v507_v0  ;;  %v175_v0 = vld [vmem:[#allocation8] sm:$0xff] }
  0x48   :  { %368 = vmatpush3.bf16.msra.mxu1 %v365_v29 }
  0x49   :  { %370 = vmatprep.subr.bf16.mxu1 %v369_v32 }
  0x4a   :  { %291 = vmatmul.mubr.msk.f32.gmra.mrb[2].mxu0 %vm60_vm0, %v64_v20 }
  0x4c   :  { %372 = vmatpush3.bf16.msra.mxu1 %v369_v32 }
  0x4d   :  { %374 = vmatprep.subr.bf16.mxu1 %v373_v35 }
  0x50   :  { %376 = vmatpush3.bf16.msra.mxu1 %v373_v35 }
  0x51   :  { %378 = vmatprep.subr.bf16.mxu1 %v377_v38 }
  0x54   :  { %380 = vmatpush3.bf16.msra.mxu1 %v377_v38 }
  0x55   :  { %382 = vmatprep.subr.bf16.mxu1 %v381_v41 }
  0x58   :  { %384 = vmatpush3.bf16.msra.mxu1 %v381_v41 }
  0x59   :  { %386 = vmatprep.subr.bf16.mxu1 %v385_v44 }
  0x5c   :  { %388 = vmatpush3.bf16.msra.mxu1 %v385_v44 }
 0x119   :  { %v150_v45 = vpop.f32.mrb[0].mxu0 }
 0x11a   :  { %v163_v46 = vsub.f32 0.0, %v150_v45  ;;  %v152_v47 = vpop.f32.mrb[1].mxu0 }
 0x11b   :  { %v161_v48 = vmul.f32 %v152_v47, %v150_v45 }
 0x11c   :  { %v165_v49 = vmul.f32 1.442695, %v163_v46 }
 0x11d   :  { %v156_v50 = vpop.f32.mrb[2].mxu0 }
 0x11e   :  { %398 = vpow2.f32 %v165_v49  ;;  %v164_v51 = vsub.f32 0.0, %v156_v50  ;;  %v158_v52 = vpop.f32.mrb[3].mxu0 }
 0x11f   :  { %v162_v53 = vmul.f32 %v158_v52, %v156_v50 }
 0x120   :  { %v167_v54 = vmul.f32 1.442695, %v164_v51 }
 0x122   :  { %400 = vpow2.f32 %v167_v54 }
 0x128   :  { %v399_v55 = vpop.eup %398 }
 0x129   :  { %v169_v56 = vadd.f32 1.0, %v399_v55 }
 0x12b   :  { %402 = vrcp.f32 %v169_v56 }
 0x12c   :  { %v401_v57 = vpop.eup %400 }
 0x12d   :  { %v170_v58 = vadd.f32 1.0, %v401_v57 }
 0x12f   :  { %404 = vrcp.f32 %v170_v58 }
 0x135   :  { %v403_v59 = vpop.eup %402 }
 0x136   :  { %v173_v60 = vmul.f32 %v403_v59, %v161_v48 }
 0x138   :  { %342 = vmatprep.mubr.f32.mxu1 %v173_v60 }
 0x139   :  { %v405_v61 = vpop.eup %404 }
 0x13a   :  { %v174_v62 = vmul.f32 %v405_v61, %v162_v53 }
 0x13c   :  { %343 = vmatmul.mubr.f32.vlgmr.msra.gmra.mrb[0].mxu1 %v174_v62 }
 0x20f   :  { %v344_v1 = vpop.f32.mrb[0].mxu1 }
 0x210   :  { %v269_v2 = vadd.f32 %v344_v1, %v176_v63  ;;  %v259_v3 = vpop.f32.mrb[1].mxu1 }
 0x211   :  { %v268_v4 = vadd.f32 %v259_v3, %v175_v0 }
 0x212   :  { %271 = vst.msk [vmem:[#allocation8 + $0x8] sm:$0xff] %vm60_vm0, %v269_v2 }
 0x213   :  { %270 = vst.msk [vmem:[#allocation8] sm:$0xff] %vm60_vm0, %v268_v4 }
 0x214   :  { %483 = shalt.err (!%p480_p0)
}
 0x215   :  { %s484_s27 = scalar_lea.hbm %s595_s3, 256 }
 0x216   :  { %p485_p1 = scmp.ne.s32.totalorder %s595_s3, %s484_s27  ;;  %p488_p2 = scmp.lt.u32.totalorder %s484_s27, %s595_s3 }
 0x218   :  { %p490_p3 = pnand %p488_p2, %p485_p1 }
 0x21a   :  { %493 = shalt.err (!%p490_p3)
}
 0x21b   :  { %283 = dma.vmem_to_hbm [thread:$0]  %s278_s23, 256, %s595_s3, [#allocation4], %s504_s1, %s504_s1, %s505_s9  }
 0x21c   :  { %498 = dma.done.wait [#allocation4], 256  }
 0x21d   :  { %499 = vsyncadd [#allocation4], 4294967040 }
 0x21e   :  { %287 = vsyncpa [#allocation3], 1 }
 0x21f   :  { %288 = vsyncpa [#allocation6], 1 }
 0x220   :  { %289 = vsyncpa [#allocation4], 1 }

</bundles_post_ra>
